<compile_context>
chip_gen: v6e
topology: v6e:2x2x1
jax: 0.10.0
libtpu: 0.0.40
codegen_flags: <defaults>
</compile_context>

<pallas_src>
import math

import jax
import jax.numpy as jnp
from jax.experimental import pallas as pl
from jax.experimental.pallas import tpu as pltpu


_BLOCK_CAP_BYTES = 2 << 20      # per-operand block cap (2 MiB)
_PALLAS_MIN_BYTES = 1 << 20     # below this, plain XLA fusion wins (launch overhead)


# ---------------------------------------------------------------------------
# Kernels (lane-dense (1, rt, 128) tiles; scale[B] lives in SMEM)
# ---------------------------------------------------------------------------

def _droppath_kernel(scale_ref, x_ref, o_ref):
    """o = scale[b] * x  on a (1, rt, 128) tile."""
    b = pl.program_id(0)
    s = scale_ref[b]                                    # f32 scalar from SMEM
    o_ref[...] = (x_ref[...].astype(jnp.float32) * s).astype(o_ref.dtype)


def _droppath_add_kernel(scale_ref, res_ref, y_ref, o_ref):
    """o = residual + scale[b] * y  (fused residual-add + drop-path)."""
    b = pl.program_id(0)
    s = scale_ref[b]
    o_ref[...] = (res_ref[...].astype(jnp.float32)
                  + y_ref[...].astype(jnp.float32) * s).astype(o_ref.dtype)


# ---------------------------------------------------------------------------
# Layout / tiling helpers
# ---------------------------------------------------------------------------

def _as_lane_dense(x):
    """(B, ...) -> (B, rows, 128). Caller guarantees E % 128 == 0."""
    B = x.shape[0]
    E = int(math.prod(x.shape[1:]))
    return x.reshape(B, E // 128, 128)


def _row_tile(rows, itemsize, B):
    """Row tile: sublane-multiple, <= ~2 MiB per operand, never overhangs `rows`,
    and (for v7x megacore) split so the grid has >= 2 programs when possible."""
    mult = 8 if itemsize >= 4 else (16 if itemsize == 2 else 32)
    target = max(mult, _BLOCK_CAP_BYTES // (128 * itemsize))
    if target >= rows:
        rt = rows                                   # full-extent block, no masking
    else:
        rt = max(mult, (target // mult) * mult)     # round DOWN, stay under cap
    # Guarantee >= 2 grid programs when the sample is splittable (v7x: 2 TCs).
    if B * pl.cdiv(rows, rt) < 2 and rows > mult:
        half = pl.cdiv(rows, 2)
        rt = min(rows, pl.cdiv(half, mult) * mult)
    return rt


def _should_use_pallas(shape, dtype, min_bytes):
    B = shape[0]
    E = int(math.prod(shape[1:]))
    if E % 128 != 0:
        return False     # avoid wrapper pad/slice traffic; let XLA fuse it instead
    return B * E * jnp.dtype(dtype).itemsize >= min_bytes


def _keep_scale(key, B, kp):
    """f32[B] per-sample scale = floor(kp + U[0,1)) / kp  (0 or 1/kp)."""
    rand = jax.random.uniform(key, (B,), dtype=jnp.float32)
    mask = jnp.floor(jnp.float32(kp) + rand)
    return mask / jnp.float32(kp)


def _fallback_scale_mul(x, scale):
    bshape = (x.shape[0],) + (1,) * (x.ndim - 1)
    return (x.astype(jnp.float32) * scale.reshape(bshape)).astype(x.dtype)


# ---------------------------------------------------------------------------
# pallas_call wrapper
# ---------------------------------------------------------------------------

def _call_droppath(scale, operands, out_dtype, fused):
    B, rows, _ = operands[0].shape
    itemsize = jnp.dtype(out_dtype).itemsize
    rt = _row_tile(rows, itemsize, B)
    grid = (B, pl.cdiv(rows, rt))

    data_spec = pl.BlockSpec((1, rt, 128), lambda b, r: (b, r, 0))
    smem_spec = pl.BlockSpec(memory_space=pltpu.MemorySpace.SMEM)
    kernel = _droppath_add_kernel if fused else _droppath_kernel

    n_ops = len(operands)
    elems = B * rows * 128
    block_bytes = rt * 128 * itemsize
    vmem_limit = int(min(max((n_ops + 1) * 2 * block_bytes + (2 << 20), 16 << 20),
                         48 << 20))
    cost = pl.CostEstimate(
        flops=int((2 if fused else 1) * elems),
        transcendentals=0,
        bytes_accessed=int((n_ops + 1) * elems * itemsize + B * 4),
    )
    # Fused path: alias output onto the residual input (operand index 1: the scale
    # array is operand 0). The residual operand is a wrapper-created reshape, so
    # aliasing it is always safe; XLA inserts a copy if it cannot donate.
    io_aliases = {1: 0} if fused else {}

    return pl.pallas_call(
        kernel,
        out_shape=jax.ShapeDtypeStruct((B, rows, 128), out_dtype),
        grid=grid,
        in_specs=[smem_spec] + [data_spec] * n_ops,
        out_specs=data_spec,
        compiler_params=pltpu.CompilerParams(
            dimension_semantics=("parallel", "parallel"),
            vmem_limit_bytes=vmem_limit),
        cost_estimate=cost,
        input_output_aliases=io_aliases,
    )(scale, *operands)


# ---------------------------------------------------------------------------
# Public API
# ---------------------------------------------------------------------------

def drop_path(x, p, key, training=True, min_pallas_bytes=_PALLAS_MIN_BYTES):
    """Standalone DropPath (matches the PyTorch module's forward)."""
    if p is None or p == 0.0 or not training:
        return x
    kp = 1.0 - p
    scale = _keep_scale(key, x.shape[0], kp)
    if not _should_use_pallas(x.shape, x.dtype, min_pallas_bytes):
        return _fallback_scale_mul(x, scale)
    x3 = _as_lane_dense(x)
    out3 = _call_droppath(scale, [x3], x.dtype, fused=False)
    return out3.reshape(x.shape)


def drop_path_add(residual, y, p, key, training=True,
                  min_pallas_bytes=_PALLAS_MIN_BYTES):
    """Fused `residual + drop_path(y)` — the pattern inside PVTv2 Block:
         x = x + drop_path(attn(norm1(x)));  x = x + drop_path(mlp(norm2(x)))
    Reads residual+y once and writes the sum once."""
    assert residual.shape == y.shape and residual.dtype == y.dtype
    if p is None or p == 0.0 or not training:
        return residual + y
    kp = 1.0 - p
    scale = _keep_scale(key, y.shape[0], kp)
    if not _should_use_pallas(y.shape, y.dtype, min_pallas_bytes):
        bshape = (y.shape[0],) + (1,) * (y.ndim - 1)
        return (residual.astype(jnp.float32)
                + y.astype(jnp.float32) * scale.reshape(bshape)).astype(y.dtype)
    r3 = _as_lane_dense(residual)
    y3 = _as_lane_dense(y)
    out3 = _call_droppath(scale, [r3, y3], y.dtype, fused=True)
    return out3.reshape(y.shape)


# ---------------------------------------------------------------------------
# Pure-JAX references (mirror the PyTorch forward exactly)
# ---------------------------------------------------------------------------

def drop_path_reference(x, p, key, training=True):
    if p is None or p == 0.0 or not training:
        return x
    kp = 1.0 - p
    B = x.shape[0]
    shape = (B,) + (1,) * (x.ndim - 1)
    rand = jax.random.uniform(key, (B,), dtype=jnp.float32)
    random_tensor = jnp.floor(kp + rand).reshape(shape).astype(x.dtype)
    return (x / kp) * random_tensor


def drop_path_add_reference(residual, y, p, key, training=True):
    return residual + drop_path_reference(y, p, key, training)


# TODO(synk): the rest of PVTv2 (attention, LayerNorm, patch-embed pools/convs) is
# left to XLA; only the DropPath / residual+DropPath hot path is a Pallas kernel.

if __name__ == "__main__":
    key = jax.random.PRNGKey(0)
    kx, ky, kmask1, kmask2 = jax.random.split(key, 4)

    # --- standalone DropPath on an NCHW activation (like x1..x4 in PVTv2) ----
    B, C, H, W = 2, 4, 16, 16
    x = jax.random.normal(kx, (B, C, H, W), dtype=jnp.float32)
    p = 0.3

    out = drop_path(x, p, kmask1, training=True, min_pallas_bytes=0)  # force kernel
    out = jax.block_until_ready(out)
    ref = drop_path_reference(x, p, kmask1, training=True)
    assert out.shape == x.shape and out.dtype == x.dtype
    assert jnp.allclose(out, ref, atol=1e-5, rtol=1e-5)

    # Eval mode is identity.
    out_eval = drop_path(x, p, kmask1, training=False)
    assert jnp.allclose(out_eval, x)

    # --- fused residual + drop_path on a (B, N, C) block activation ----------
    Bn, N, Cc = 2, 64, 64            # small PVTv2-block-like shape
    res = jax.random.normal(ky, (Bn, N, Cc), dtype=jnp.float32)
    yact = jax.random.normal(kx, (Bn, N, Cc), dtype=jnp.float32)
    p2 = 0.1

    fused_ref = drop_path_add_reference(res, yact, p2, kmask2, training=True)
    fused = drop_path_add(res, yact, p2, kmask2, training=True, min_pallas_bytes=0)
    fused = jax.block_until_ready(fused)
    assert fused.shape == res.shape and fused.dtype == res.dtype
    assert jnp.allclose(fused, fused_ref, atol=1e-5, rtol=1e-5)

    # Auto-dispatch (small tensor -> plain XLA fusion path), still correct.
    fused_auto = drop_path_add(res, yact, p2, kmask2, training=True)
    assert jnp.allclose(fused_auto, fused_ref, atol=1e-5, rtol=1e-5)

    # Fused eval mode reduces to a plain residual add.
    fused_eval = drop_path_add(res, yact, p2, kmask2, training=False)
    assert jnp.allclose(fused_eval, res + yact)

    print("KERNEL_OK")
</pallas_src>

<mosaic_0001>
module attributes {stable_mosaic.version = 11 : i64} {
  func.func @_droppath_kernel(%arg0: i32, %arg1: i32, %arg2: memref<2xf32, #tpu.memory_space<smem>>, %arg3: memref<1x8x128xf32, #tpu.memory_space<vmem>>, %arg4: memref<1x8x128xf32, #tpu.memory_space<vmem>>) attributes {dimension_semantics = [#tpu.dimension_semantics<parallel>, #tpu.dimension_semantics<parallel>], iteration_bounds = array<i64: 2, 1>, scalar_prefetch = 0 : i64, scratch_operands = 0 : i64, tpu.core_type = #tpu.core_type<tc>, window_params = [{transform_indices = @transform_0, window_bounds = array<i64: 2>}, {transform_indices = @transform_1, window_bounds = array<i64: 1, 8, 128>}, {transform_indices = @transform_2, window_bounds = array<i64: 1, 8, 128>}]} {
    %0 = arith.index_cast %arg0 : i32 to index
    %1 = memref.load %arg2[%0] : memref<2xf32, #tpu.memory_space<smem>>
    %c0 = arith.constant 0 : index
    %c0_0 = arith.constant 0 : index
    %c0_1 = arith.constant 0 : index
    %2 = vector.load %arg3[%c0, %c0_0, %c0_1] : memref<1x8x128xf32, #tpu.memory_space<vmem>>, vector<1x8x128xf32>
    %3 = vector.broadcast %1 : f32 to vector<1x8x128xf32>
    %4 = arith.mulf %2, %3 : vector<1x8x128xf32>
    %c0_2 = arith.constant 0 : index
    %c0_3 = arith.constant 0 : index
    %c0_4 = arith.constant 0 : index
    %5 = vector.load %arg4[%c0_2, %c0_3, %c0_4] : memref<1x8x128xf32, #tpu.memory_space<vmem>>, vector<1x8x128xf32>
    tpu.vector_store %arg4[%c0_2, %c0_3, %c0_4], %4 {strides = array<i32>} : memref<1x8x128xf32, #tpu.memory_space<vmem>>, vector<1x8x128xf32>,
    return
  }
  func.func @transform_0(%arg0: i32, %arg1: i32) -> i32 {
    %c0_i32 = arith.constant 0 : i32
    %c0_i32_0 = arith.constant 0 : i32
    return %c0_i32 : i32
  }
  func.func @transform_1(%arg0: i32, %arg1: i32) -> (i32, i32, i32) {
    %c0_i32 = arith.constant 0 : i32
    %c0_i32_0 = arith.constant 0 : i32
    return %arg0, %arg1, %c0_i32 : i32, i32, i32
  }
  func.func @transform_2(%arg0: i32, %arg1: i32) -> (i32, i32, i32) {
    %c0_i32 = arith.constant 0 : i32
    %c0_i32_0 = arith.constant 0 : i32
    return %arg0, %arg1, %c0_i32 : i32, i32, i32
  }
}

</mosaic_0001>

<bundles_post_ra>
// kernel: tpu_custom_call.1
= control target key start
LH: loop header
LB: loop body
LE: loop exit
PB: predicated region body
PF: predicated region fallthrough
CT: control target
= control target key end

     0   :  { %7 = vsyncpa [#allocation5], 0  ;;  %s691_s0 = inlined_call_operand.hbm [shape: f32[2], index: 0, kind: input, shape index: {}]   ;;  %s692_s1 = inlined_call_operand.hbm [shape: f32[2,8,128], index: 1, kind: input, shape index: {}]   ;;  %s693_s2 = inlined_call_operand.hbm [shape: f32[2,8,128], index: 2, kind: output, shape index: {}]  }
   0x1   :  { %8 = vsyncpa [#allocation3], 0 }
   0x2   :  { %10 = vsyncpa [#allocation3 + $0x1], 0 }
   0x3   :  { %11 = vsyncpa [#allocation4], 0 }
   0x4   :  { %13 = vsyncpa [#allocation4 + $0x1], 0  ;;  %s531_s9 = smov 0   ;;  %s533_s10 = smov 0  }
   0x5   :  { %s535_s11 = smov 0   ;;  %s537_s12 = smov 0  }
   0x6   :  { %s539_s13 = smov 0   ;;  %s541_s14 = smov 0  }
   0x7 LB: > { %s300_s15 = sadd.s32 4294967295, %s511_s14   ;;  %s301_s16 = sadd.s32 4294967294, %s511_s14   ;;  %s511_s14 = sphi %s541_s14, %s19_s14   ;;  %s507_s13 = sphi %s539_s13, %s710_s13   ;;  %s503_s12 = sphi %s537_s12, %s709_s12   ;;  %s499_s11 = sphi %s535_s11, %s708_s11   ;;  %s495_s10 = sphi %s533_s10, %s707_s10   ;;  %s491_s9 = sphi %s531_s9, %s706_s9  }
   0x8   : > { %p74_p0 = scmp.ne.s32.totalorder %s495_s10, %s491_s9  ;;  %p565_p1 = scmp.eq.s32.totalorder %s300_s15, 0 }
   0x9   : > { %p569_p2 = scmp.eq.s32.totalorder %s300_s15, 1  ;;  %p106_p3 = scmp.eq.s32.totalorder %s301_s16, 1 }
   0xa   : > { %p575_p4 = por %p565_p1, %p74_p0  ;;  %p302_p5 = scmp.ge.s32.totalorder %s511_s14, 1 }
   0xb   : > { %p580_p6 = por %p106_p3, %p74_p0  ;;  %p113_p7 = scmp.lt.s32.totalorder %s511_s14, 3 }
   0xc   : > { %s31_s22 = sadd.s32 1, %s507_s13  ;;  %s61_s23 = sadd.s32 1, %s499_s11 }
   0xd   : > { %s698_s20 = scalar_select %p580_p6, 1, 0 }
   0xe   : > { %p585_p8 = pnand %p302_p5, %p113_p7  ;;  %p33_p12 = scmp.ge.s32.totalorder %s31_s22, 2 }
   0xf   : > { %p68_p13 = scmp.ne.s32.totalorder %s499_s11, %s495_s10  ;;  %p69_p0 = scmp.eq.s32.totalorder %s511_s14, 0 }
  0x10   : > { %p323_p10 = pneg %p585_p8  ;;  %s513_s24 = smov [#allocation2]  }
  0x11   : > { %s712_s22 = smov (%p33_p12, %s31_s22), 0  ;;  %p604_p3 = por %p69_p0, %p68_p13 }
  0x12   : > { %p324_p11 = pnand %p323_p10, %p565_p1  ;;  %p610_p5 = por %p569_p2, %p68_p13 }
  0x13   : > { %s56_s29 = ssub.s32 %s507_s13, %s712_s22  ;;  %p336_p7 = scmp.lt.s32.totalorder %s511_s14, 2 }
  0x14   : > { %326 = dma.hbm_to_smem (!%p324_p11), %s691_s0, 16, %s513_s24, [#allocation5]  }
  0x15   : > { %s701_s28 = scalar_select %p610_p5, 1, 0 }
  0x16   : > { %p59_p10 = scmp.eq.s32.totalorder %s56_s29, 0  ;;  %s135_s30 = sand.u32 1, %s499_s11  }
  0x17   : > { %s305_s3 = sshll.u32 %s135_s30, 3  ;;  %s306_s5 = sshll.u32 %s507_s13, 7 }
  0x18   : > { %s619_s4 = scalar_select %p59_p10, %s499_s11, %s61_s23  }
  0x19   : > { %s145_s8 = scalar_lea.hbm %s692_s1, %s306_s5  ;;  %s139_s15 = scalar_lea.vmem [#allocation6], %s305_s3 }
  0x1a   : > { %s147_s16 = sshll.u32 %s139_s15, 4  ;;  %p627_p2 = pnand %p336_p7, %p604_p3  ;;  %s148_s16 = int_to_ptr.vmem [resolvable:$true] %s147_s16 }
  0x1b   : > { %s136_s24 = scalar_lea.sflag [#allocation3], %s135_s30  ;;  %s412_s25 = scalar_lea.vmem %s148_s16, 128 }
  0x1c   : > { %p401_p11 = pneg %p627_p2  ;;  %p413_p12 = scmp.ne.s32.totalorder %s148_s16, %s412_s25 }
  0x1d   : > { %s514_s23 = smov [#allocation6]  }
  0x1e   : > { %p415_p13 = pnand %p413_p12, %p401_p11  ;;  %s417_s26 = sshll.u32 %s514_s23, 4  ;;  %s418_s26 = int_to_ptr.vmem [resolvable:$false] %s417_s26 }
  0x1f   : > { %s419_s29 = scalar_lea.vmem %s418_s26, 256  ;;  %p420_p10 = scmp.lt.s32.totalorder %s148_s16, %s418_s26 }
  0x20   : > { %p416_p0 = pneg %p415_p13  ;;  %p421_p9 = scmp.lt.s32.totalorder %s419_s29, %s412_s25 }
  0x22   : > { %p422_p6 = por %p421_p9, %p420_p10 }
  0x24   : > { %p423_p5 = pnand %p422_p6, %p416_p0 }
  0x26   : > { %426 = shalt.err (!%p423_p5)
}
  0x27   : > { %330 = dma.hbm_to_vmem [thread:$0]  (!%p627_p2), %s145_s8, 128, %s148_s16, %s136_s24  }
  0x28   : > { %156 = sbr.rel (%p585_p8) target bundleno = 77 (0x4d), region = 28 }
  0x2d   : > { %478 = dma.done.wait (%p565_p1), [#allocation5], 16  }
  0x2e   : > { %480 = vsyncadd (%p565_p1), [#allocation5], 4294967280  ;;  %s642_s27 = sand.u32 1, %s495_s10  }
  0x2f   : > { %s309_s30 = sshll.u32 %s642_s27, 3  ;;  %s163_s3 = scalar_lea.sflag [#allocation3], %s642_s27 }
  0x30   : > { %s166_s5 = scalar_lea.vmem [#allocation6], %s309_s30 }
  0x31   : > { %482 = dma.done.wait (%p575_p4), %s163_s3, 128  }
  0x32   : > { %484 = vsyncadd (%p575_p4), %s163_s3, 4294967168 }
  0x33   : > { %171 = sfence }
  0x34   : > { %s188_s17 = sld [smem:[#allocation2 + %s503_s12]]  ;;  %v189_v0 = vld [vmem:[%s166_s5] sm:$0xff]  ;;  %s187_s21 = scalar_lea.vmem [#allocation7], %s309_s30 }
  0x35   : > { %s208_s6 = sshll.u32 %s187_s21, 4  ;;  %s312_s7 = sshll.u32 %s503_s12, 7  ;;  %s209_s6 = int_to_ptr.vmem [resolvable:$true] %s208_s6 }
  0x36   : > { %s206_s16 = scalar_lea.hbm %s693_s2, %s312_s7  ;;  %s194_s19 = scalar_lea.sflag [#allocation4], %s642_s27 }
  0x37   : > { %s427_s18 = scalar_lea.vmem %s209_s6, 128  ;;  %p703_p4 = scmp.ne.s32.totalorder %s701_s28, 0 }
  0x38   : > { %p428_p1 = scmp.ne.s32.totalorder %s209_s6, %s427_s18  ;;  %s515_s24 = smov [#allocation7]  }
  0x39   : > { %s431_s25 = sshll.u32 %s515_s24, 4  ;;  %s432_s25 = int_to_ptr.vmem [resolvable:$false] %s431_s25 }
  0x3a   : > { %v190_v1 = vstv %s188_s17  ;;  %p429_p6 = pnand %p428_p1, %p703_p4  ;;  %s433_s23 = scalar_lea.vmem %s432_s25, 256 }
  0x3b   : > { %v191_v2 = vmul.f32 %v190_v1, %v189_v0  ;;  %p434_p9 = scmp.lt.s32.totalorder %s209_s6, %s432_s25  ;;  %p435_p3 = scmp.lt.s32.totalorder %s433_s23, %s427_s18 }
  0x3c   : > { %p430_p8 = pneg %p429_p6 }
  0x3d   : > { %192 = vst [vmem:[%s187_s21] sm:$0xff] %v191_v2  ;;  %p436_p5 = por %p435_p3, %p434_p9 }
  0x3f   : > { %p437_p7 = pnand %p436_p5, %p430_p8 }
  0x41   : > { %440 = shalt.err (!%p437_p7)
}
  0x42   : > { %s441_s12 = scalar_lea.hbm %s206_s16, 128  ;;  %s445_s27 = scalar_lea.hbm %s693_s2, 256 }
  0x43   : > { %p442_p2 = scmp.ne.s32.totalorder %s206_s16, %s441_s12  ;;  %p446_p13 = scmp.lt.s32.totalorder %s206_s16, %s693_s2 }
  0x44   : > { %p447_p0 = scmp.lt.s32.totalorder %s445_s27, %s441_s12 }
  0x45   : > { %p443_p11 = pnand %p442_p2, %p703_p4 }
  0x46   : > { %p448_p10 = por %p447_p0, %p446_p13 }
  0x47   : > { %p444_p12 = pneg %p443_p11 }
  0x49   : > { %p449_p1 = pnand %p448_p10, %p444_p12 }
  0x4b   : > { %452 = shalt.err (!%p449_p1)
}
  0x4c   : > { %321 = dma.vmem_to_hbm [thread:$0]  (%p703_p4), %s209_s6, 128, %s206_s16, %s194_s19  }
  0x4d PF: > { %s220_s5 = sand.u32 1, %s491_s9   ;;  %p704_p6 = scmp.ne.s32.totalorder %s698_s20, 0 }
  0x4e   : > { %p705_p8 = scmp.ge.s32.totalorder %s511_s14, 2  ;;  %s221_s17 = scalar_lea.sflag [#allocation4], %s220_s5 }
  0x50   : > { %p332_p9 = pnand %p705_p8, %p704_p6 }
  0x52   : > { %p333_p3 = pneg %p332_p9 }
  0x54   : > { %486 = dma.done.wait (%p333_p3), %s221_s17, 128  }
  0x55   : > { %488 = vsyncadd (%p333_p3), %s221_s17, 4294967168  ;;  %s19_s14 = sadd.s32 1, %s511_s14   ;;  %s706_s9 = smov %s495_s10 }
  0x56   : > { %p16_p5 = scmp.ge.s32.totalorder %s19_s14, 4   ;;  %s707_s10 = smov %s499_s11 }
  0x57   : > { %s708_s11 = smov %s619_s4  ;;  %s709_s12 = smov %s507_s13 }
  0x58   : > { %s710_s13 = smov %s712_s22  ;;  %18 = sbr.rel (!%p16_p5) target bundleno = 7 (0x7), region = 78 }
  0x5d   :  { %226 = vsyncpa [#allocation3], 1 }
  0x5e   :  { %228 = vsyncpa [#allocation3 + $0x1], 1 }
  0x5f   :  { %229 = vsyncpa [#allocation4], 1 }
  0x60   :  { %231 = vsyncpa [#allocation4 + $0x1], 1 }
  0x61   :  { %232 = vsyncpa [#allocation5], 1 }
  0x62   :  { %234 = vsyncpa [#allocation5 + $0x1], 1 }

</bundles_post_ra>
